<compile_context>
chip_gen: v5e
topology: v5e:2x2
jax: 0.10.0
libtpu: 0.0.40
codegen_flags: <defaults>
</compile_context>

<pallas_src>
import jax
import jax.numpy as jnp
from jax.experimental import pallas as pl
from jax.experimental.pallas import tpu as pltpu  # noqa: F401  (kept for TPU-specific tuning hooks)


# ----------------------------- fused Pallas kernel ---------------------------

def make_fused_kernel(num_layers):
    """Returns a kernel computing the full GCNs forward for `num_layers` GCN layers.

    Ref order: adj, h, (w_gcn, b_gcn) * num_layers, w1f, b1f, w2f, b2f, w3, b3, out.
    (w1f/b1f, w2f/b2f have eval-mode BatchNorm pre-folded into them.)
    """

    def kernel(*refs):
        adj_ref, h_ref = refs[0], refs[1]
        gcn_refs = refs[2:2 + 2 * num_layers]
        w1_ref, b1_ref, w2_ref, b2_ref, w3_ref, b3_ref = refs[2 + 2 * num_layers:-1]
        out_ref = refs[-1]

        adj = adj_ref[...]                       # [B, N, N]
        h = h_ref[...]                           # [B, N, Din]
        B, N, _ = h.shape

        # --- GCN layers: h = relu((adj @ h) @ W + b) ---
        for l in range(num_layers):
            w_ref, b_ref = gcn_refs[2 * l], gcn_refs[2 * l + 1]
            # batched aggregation: adj @ h  (MXU, batch dims handled by dot_general)
            ah = jnp.einsum('bij,bjf->bif', adj, h,
                            preferred_element_type=jnp.float32)          # [B, N, F]
            # shared-weight transform as ONE flattened GEMM (B*N rows), bias + ReLU fused
            hw = jnp.dot(ah.reshape(B * N, ah.shape[-1]), w_ref[...],
                         preferred_element_type=jnp.float32)             # [B*N, H]
            h = jnp.maximum(hw + b_ref[...], 0.0).reshape(B, N, -1)      # [B, N, H]

        # --- 'sum' pooling over node axis (never leaves VMEM) ---
        pooled = jnp.sum(h, axis=1)                                      # [B, H]

        # --- prediction head (BN folded into Linear; Dropout == identity in eval) ---
        x = jnp.maximum(jnp.dot(pooled, w1_ref[...],
                                preferred_element_type=jnp.float32) + b1_ref[...], 0.0)
        x = jnp.maximum(jnp.dot(x, w2_ref[...],
                                preferred_element_type=jnp.float32) + b2_ref[...], 0.0)
        out_ref[...] = jnp.dot(x, w3_ref[...],
                               preferred_element_type=jnp.float32) + b3_ref[...]

    return kernel


# ------------------------------ wrapper --------------------------------------

def gcns_forward(adj, h, params):
    num_layers = len(params["gcn"])
    B = adj.shape[0]
    head = params["head"]
    class_dim = head["w3"].shape[-1]

    # Fold eval-mode BatchNorm (scale s, shift t) into the preceding Linear:
    #   y = (x W + b) * s + t  ==  x (W*s) + (b*s + t)
    w1f = head["w1"] * head["s1"]
    b1f = head["b1"] * head["s1"] + head["t1"]
    w2f = head["w2"] * head["s2"]
    b2f = head["b2"] * head["s2"] + head["t2"]

    gcn_flat = [a for wb in params["gcn"] for a in wb]

    # Single un-gridded pallas_call: all operands fit comfortably in VMEM on
    # v5e / v6e / v7x, so no BlockSpec tiling / grid is needed at these shapes.
    return pl.pallas_call(
        make_fused_kernel(num_layers),
        out_shape=jax.ShapeDtypeStruct((B, class_dim), jnp.float32),
    )(adj, h, *gcn_flat, w1f, b1f, w2f, b2f, head["w3"], head["b3"])


# ------------------------ deterministic parameter init -----------------------

def xavier_uniform(key, shape, gain):
    fan_in, fan_out = shape
    a = gain * jnp.sqrt(6.0 / (fan_in + fan_out))
    return jax.random.uniform(key, shape, jnp.float32, -a, a)


def linear_init(key, in_dim, out_dim):
    # torch Linear default init, weight stored transposed as (in, out).
    kw, kb = jax.random.split(key)
    bound = 1.0 / jnp.sqrt(jnp.float32(in_dim))
    w = jax.random.uniform(kw, (in_dim, out_dim), jnp.float32, -bound, bound)
    b = jax.random.uniform(kb, (1, out_dim), jnp.float32, -bound, bound)
    return w, b


def make_params(key, input_dim, hidden_dim=64, class_dim=2, num_layers=2):
    keys = jax.random.split(key, num_layers + 3)
    relu_gain = jnp.sqrt(2.0)

    gcn = []
    pre = input_dim
    for i in range(num_layers):
        w = xavier_uniform(keys[i], (pre, hidden_dim), relu_gain)
        b = jnp.full((1, hidden_dim), 1e-5, jnp.float32)
        gcn.append((w, b))
        pre = hidden_dim

    # pred head: Linear(hidden,128) BN ReLU Drop | Linear(128,32) BN ReLU Drop | Linear(32,class_dim)
    w1, b1 = linear_init(keys[num_layers + 0], hidden_dim, 128)
    w2, b2 = linear_init(keys[num_layers + 1], 128, 32)
    w3, b3 = linear_init(keys[num_layers + 2], 32, class_dim)

    eps = 1e-5

    # BatchNorm1d at init / eval: gamma=1, beta=0, running_mean=0, running_var=1
    def bn_fold(dim):
        gamma = jnp.ones((1, dim), jnp.float32)
        beta = jnp.zeros((1, dim), jnp.float32)
        rm = jnp.zeros((1, dim), jnp.float32)
        rv = jnp.ones((1, dim), jnp.float32)
        scale = gamma / jnp.sqrt(rv + eps)
        shift = beta - rm * scale
        return scale, shift

    s1, t1 = bn_fold(128)
    s2, t2 = bn_fold(32)

    head = dict(w1=w1, b1=b1, s1=s1, t1=t1,
                w2=w2, b2=b2, s2=s2, t2=t2,
                w3=w3, b3=b3)
    return {"gcn": gcn, "head": head}


# --------------------------- pure-JAX reference -------------------------------

def gcns_reference(adj, h, params):
    for (w, b) in params["gcn"]:
        h = jnp.maximum(jnp.matmul(jnp.matmul(adj, h), w) + b, 0.0)
    p = params["head"]
    x = jnp.sum(h, axis=-2)
    x = jnp.maximum((x @ p["w1"] + p["b1"]) * p["s1"] + p["t1"], 0.0)
    x = jnp.maximum((x @ p["w2"] + p["b2"]) * p["s2"] + p["t2"], 0.0)
    return x @ p["w3"] + p["b3"]


# --------------------------------- main ---------------------------------------

if __name__ == "__main__":
    key = jax.random.PRNGKey(0)
    k_adj, k_h, k_p = jax.random.split(key, 3)

    B, N, Din = 2, 16, 16            # small shapes; module defaults hidden=64, classes=2
    hidden_dim, class_dim = 64, 2

    # symmetric adjacency
    a = jax.random.uniform(k_adj, (B, N, N), jnp.float32)
    adj = (a + jnp.swapaxes(a, -1, -2)) * 0.5
    h = jax.random.normal(k_h, (B, N, Din), jnp.float32)

    params = make_params(k_p, Din, hidden_dim=hidden_dim, class_dim=class_dim, num_layers=2)

    fwd = jax.jit(gcns_forward)
    out = jax.block_until_ready(fwd(adj, h, params))
    ref = jax.block_until_ready(gcns_reference(adj, h, params))

    assert out.shape == (B, class_dim), out.shape
    assert jnp.allclose(out, ref, atol=1e-3, rtol=1e-3), (out, ref)
    print("KERNEL_OK")
</pallas_src>

<mosaic_0001>
module attributes {stable_mosaic.version = 11 : i64} {
  func.func @kernel(%arg0: memref<2x16x16xf32, #tpu.memory_space<vmem>>, %arg1: memref<2x16x16xf32, #tpu.memory_space<vmem>>, %arg2: memref<16x64xf32, #tpu.memory_space<vmem>>, %arg3: memref<1x64xf32, #tpu.memory_space<vmem>>, %arg4: memref<64x64xf32, #tpu.memory_space<vmem>>, %arg5: memref<1x64xf32, #tpu.memory_space<vmem>>, %arg6: memref<64x128xf32, #tpu.memory_space<vmem>>, %arg7: memref<1x128xf32, #tpu.memory_space<vmem>>, %arg8: memref<128x32xf32, #tpu.memory_space<vmem>>, %arg9: memref<1x32xf32, #tpu.memory_space<vmem>>, %arg10: memref<32x2xf32, #tpu.memory_space<vmem>>, %arg11: memref<1x2xf32, #tpu.memory_space<vmem>>, %arg12: memref<2x2xf32, #tpu.memory_space<vmem>>) attributes {dimension_semantics = [], scalar_prefetch = 0 : i64, scratch_operands = 0 : i64, tpu.core_type = #tpu.core_type<tc>} {
    %c0 = arith.constant 0 : index
    %c0_0 = arith.constant 0 : index
    %c0_1 = arith.constant 0 : index
    %0 = vector.load %arg0[%c0, %c0_0, %c0_1] : memref<2x16x16xf32, #tpu.memory_space<vmem>>, vector<2x16x16xf32>
    %c0_2 = arith.constant 0 : index
    %c0_3 = arith.constant 0 : index
    %c0_4 = arith.constant 0 : index
    %1 = vector.load %arg1[%c0_2, %c0_3, %c0_4] : memref<2x16x16xf32, #tpu.memory_space<vmem>>, vector<2x16x16xf32>
    "tpu.trace_start"() <{level = 10 : i32, message = "bij,bjf->bif"}> : () -> ()
    %cst = arith.constant dense<0.000000e+00> : vector<2x16x16xf32>
    %2 = tpu.matmul %0, %1, %cst {dimension_numbers = #tpu.dot_dimension_numbers<[2], [1], [1], [2], [0, 0, 0, 1, 1, 2], [0], [0]>} : vector<2x16x16xf32>, vector<2x16x16xf32>, vector<2x16x16xf32> -> vector<2x16x16xf32>
    "tpu.trace_stop"() : () -> ()
    %3 = vector.shape_cast %2 : vector<2x16x16xf32> to vector<32x16xf32>
    %c0_5 = arith.constant 0 : index
    %c0_6 = arith.constant 0 : index
    %4 = vector.load %arg2[%c0_5, %c0_6] : memref<16x64xf32, #tpu.memory_space<vmem>>, vector<16x64xf32>
    %cst_7 = arith.constant dense<0.000000e+00> : vector<32x64xf32>
    %5 = tpu.matmul %3, %4, %cst_7 {dimension_numbers = #tpu.dot_dimension_numbers<[1], [0], [0], [1], [0, 0, 1, 1], [], []>} : vector<32x16xf32>, vector<16x64xf32>, vector<32x64xf32> -> vector<32x64xf32>
    %c0_8 = arith.constant 0 : index
    %c0_9 = arith.constant 0 : index
    %6 = vector.load %arg3[%c0_8, %c0_9] : memref<1x64xf32, #tpu.memory_space<vmem>>, vector<1x64xf32>
    %7 = vector.broadcast %6 : vector<1x64xf32> to vector<32x64xf32>
    %8 = arith.addf %5, %7 : vector<32x64xf32>
    %cst_10 = arith.constant 0.000000e+00 : f32
    %9 = vector.broadcast %cst_10 : f32 to vector<32x64xf32>
    %10 = arith.maximumf %8, %9 : vector<32x64xf32>
    %11 = vector.shape_cast %10 : vector<32x64xf32> to vector<2x16x64xf32>
    "tpu.trace_start"() <{level = 10 : i32, message = "bij,bjf->bif"}> : () -> ()
    %cst_11 = arith.constant dense<0.000000e+00> : vector<2x16x64xf32>
    %12 = tpu.matmul %0, %11, %cst_11 {dimension_numbers = #tpu.dot_dimension_numbers<[2], [1], [1], [2], [0, 0, 0, 1, 1, 2], [0], [0]>} : vector<2x16x16xf32>, vector<2x16x64xf32>, vector<2x16x64xf32> -> vector<2x16x64xf32>
    "tpu.trace_stop"() : () -> ()
    %13 = vector.shape_cast %12 : vector<2x16x64xf32> to vector<32x64xf32>
    %c0_12 = arith.constant 0 : index
    %c0_13 = arith.constant 0 : index
    %14 = vector.load %arg4[%c0_12, %c0_13] : memref<64x64xf32, #tpu.memory_space<vmem>>, vector<64x64xf32>
    %cst_14 = arith.constant dense<0.000000e+00> : vector<32x64xf32>
    %15 = tpu.matmul %13, %14, %cst_14 {dimension_numbers = #tpu.dot_dimension_numbers<[1], [0], [0], [1], [0, 0, 1, 1], [], []>} : vector<32x64xf32>, vector<64x64xf32>, vector<32x64xf32> -> vector<32x64xf32>
    %c0_15 = arith.constant 0 : index
    %c0_16 = arith.constant 0 : index
    %16 = vector.load %arg5[%c0_15, %c0_16] : memref<1x64xf32, #tpu.memory_space<vmem>>, vector<1x64xf32>
    %17 = vector.broadcast %16 : vector<1x64xf32> to vector<32x64xf32>
    %18 = arith.addf %15, %17 : vector<32x64xf32>
    %cst_17 = arith.constant 0.000000e+00 : f32
    %19 = vector.broadcast %cst_17 : f32 to vector<32x64xf32>
    %20 = arith.maximumf %18, %19 : vector<32x64xf32>
    %21 = vector.shape_cast %20 : vector<32x64xf32> to vector<2x16x64xf32>
    %cst_18 = arith.constant dense<0.000000e+00> : vector<2x64xf32>
    %22 = vector.multi_reduction <add>, %21, %cst_18 [1] : vector<2x16x64xf32> to vector<2x64xf32>
    %c0_19 = arith.constant 0 : index
    %c0_20 = arith.constant 0 : index
    %23 = vector.load %arg6[%c0_19, %c0_20] : memref<64x128xf32, #tpu.memory_space<vmem>>, vector<64x128xf32>
    %cst_21 = arith.constant dense<0.000000e+00> : vector<2x128xf32>
    %24 = tpu.matmul %22, %23, %cst_21 {dimension_numbers = #tpu.dot_dimension_numbers<[1], [0], [0], [1], [0, 0, 1, 1], [], []>} : vector<2x64xf32>, vector<64x128xf32>, vector<2x128xf32> -> vector<2x128xf32>
    %c0_22 = arith.constant 0 : index
    %c0_23 = arith.constant 0 : index
    %25 = vector.load %arg7[%c0_22, %c0_23] : memref<1x128xf32, #tpu.memory_space<vmem>>, vector<1x128xf32>
    %26 = vector.broadcast %25 : vector<1x128xf32> to vector<2x128xf32>
    %27 = arith.addf %24, %26 : vector<2x128xf32>
    %cst_24 = arith.constant 0.000000e+00 : f32
    %28 = vector.broadcast %cst_24 : f32 to vector<2x128xf32>
    %29 = arith.maximumf %27, %28 : vector<2x128xf32>
    %c0_25 = arith.constant 0 : index
    %c0_26 = arith.constant 0 : index
    %30 = vector.load %arg8[%c0_25, %c0_26] : memref<128x32xf32, #tpu.memory_space<vmem>>, vector<128x32xf32>
    %cst_27 = arith.constant dense<0.000000e+00> : vector<2x32xf32>
    %31 = tpu.matmul %29, %30, %cst_27 {dimension_numbers = #tpu.dot_dimension_numbers<[1], [0], [0], [1], [0, 0, 1, 1], [], []>} : vector<2x128xf32>, vector<128x32xf32>, vector<2x32xf32> -> vector<2x32xf32>
    %c0_28 = arith.constant 0 : index
    %c0_29 = arith.constant 0 : index
    %32 = vector.load %arg9[%c0_28, %c0_29] : memref<1x32xf32, #tpu.memory_space<vmem>>, vector<1x32xf32>
    %33 = vector.broadcast %32 : vector<1x32xf32> to vector<2x32xf32>
    %34 = arith.addf %31, %33 : vector<2x32xf32>
    %cst_30 = arith.constant 0.000000e+00 : f32
    %35 = vector.broadcast %cst_30 : f32 to vector<2x32xf32>
    %36 = arith.maximumf %34, %35 : vector<2x32xf32>
    %c0_31 = arith.constant 0 : index
    %c0_32 = arith.constant 0 : index
    %37 = vector.load %arg10[%c0_31, %c0_32] : memref<32x2xf32, #tpu.memory_space<vmem>>, vector<32x2xf32>
    %cst_33 = arith.constant dense<0.000000e+00> : vector<2x2xf32>
    %38 = tpu.matmul %36, %37, %cst_33 {dimension_numbers = #tpu.dot_dimension_numbers<[1], [0], [0], [1], [0, 0, 1, 1], [], []>} : vector<2x32xf32>, vector<32x2xf32>, vector<2x2xf32> -> vector<2x2xf32>
    %c0_34 = arith.constant 0 : index
    %c0_35 = arith.constant 0 : index
    %39 = vector.load %arg11[%c0_34, %c0_35] : memref<1x2xf32, #tpu.memory_space<vmem>>, vector<1x2xf32>
    %40 = vector.broadcast %39 : vector<1x2xf32> to vector<2x2xf32>
    %41 = arith.addf %38, %40 : vector<2x2xf32>
    %c0_36 = arith.constant 0 : index
    %c0_37 = arith.constant 0 : index
    %42 = vector.load %arg12[%c0_36, %c0_37] : memref<2x2xf32, #tpu.memory_space<vmem>>, vector<2x2xf32>
    tpu.vector_store %arg12[%c0_36, %c0_37], %41 {strides = array<i32>} : memref<2x2xf32, #tpu.memory_space<vmem>>, vector<2x2xf32>,
    return
  }
}

</mosaic_0001>

<bundles_post_ra>
// kernel: gcns_forward.1
= control target key start
LH: loop header
LB: loop body
LE: loop exit
PB: predicated region body
PF: predicated region fallthrough
CT: control target
= control target key end

     0   :  { %vm50_vm0 = vcmask 130048   ;;  %s713_s0 = inlined_call_operand.vmem [shape: f32[2,16,16], index: 0, kind: input, shape index: {}]   ;;  %s714_s1 = inlined_call_operand.vmem [shape: f32[2,16,16], index: 1, kind: input, shape index: {}]   ;;  %s715_s2 = inlined_call_operand.vmem [shape: f32[16,64], index: 2, kind: input, shape index: {}]   ;;  %s716_s3 = inlined_call_operand.vmem [shape: f32[1,64], index: 3, kind: input, shape index: {}]   ;;  %s717_s4 = inlined_call_operand.vmem [shape: f32[64,64], index: 4, kind: input, shape index: {}]   ;;  %s718_s5 = inlined_call_operand.vmem [shape: f32[1,64], index: 5, kind: input, shape index: {}]   ;;  %s719_s6 = inlined_call_operand.vmem [shape: f32[64,128], index: 6, kind: input, shape index: {}]   ;;  %s720_s7 = inlined_call_operand.vmem [shape: f32[1,128], index: 7, kind: input, shape index: {}]   ;;  %s721_s8 = inlined_call_operand.vmem [shape: f32[128,32], index: 8, kind: input, shape index: {}]   ;;  %s722_s9 = inlined_call_operand.vmem [shape: f32[1,32], index: 9, kind: input, shape index: {}]   ;;  %s723_s10 = inlined_call_operand.vmem [shape: f32[32,2], index: 10, kind: input, shape index: {}]   ;;  %s724_s11 = inlined_call_operand.vmem [shape: f32[1,2], index: 11, kind: input, shape index: {}]   ;;  %s725_s12 = inlined_call_operand.hbm [shape: f32[2,2], index: 12, kind: output, shape index: {}]  }
   0x1   :  { %v47_v0 = vld [vmem:[%s714_s1 + $0x8] sm:$0xff]  ;;  %v46_v1 = vld [vmem:[%s714_s1] sm:$0xff]  ;;  %v49_v3 = vld [vmem:[%s714_s1 + $0x18] sm:$0xff] }
   0x2   :  { %71 = vmatpush.msra.mxu0 %v47_v0  ;;  %v42_v2 = vld [vmem:[%s713_s0] sm:$0xff]  ;;  %v48_v4 = vld [vmem:[%s714_s1 + $0x10] sm:$0xff]  ;;  %100 = vmatpush.msra.mxu1 %v49_v3  ;;  %v110_v6 = vld [vmem:[%s715_s2 + $0x8] sm:$0xff] }
   0x3   :  { %v44_v5 = vld [vmem:[%s713_s0 + $0x10] sm:$0xff]  ;;  %141 = vmatpush.msra.mxu2 %v110_v6 }
   0x4   :  { %72 = vmatpush.msra.mxu0 %v46_v1  ;;  %101 = vmatpush.msra.mxu1 %v48_v4 }
   0x5   :  { %412 = vmatmul.msk.f32.vlgmr.msra.gmra.mxu0 %vm50_vm0, %v42_v2 }
   0x6   :  { %17 = vsyncpa [#allocation3], 0  ;;  %414 = vmatmul.msk.f32.vlgmr.msra.gmra.mxu1 %vm50_vm0, %v44_v5  ;;  %v43_v7 = vld [vmem:[%s713_s0 + $0x8] sm:$0xff]  ;;  %v45_v8 = vld [vmem:[%s713_s0 + $0x18] sm:$0xff]  ;;  %vm218_vm1 = vcmask 523264   ;;  %vm296_vm2 = vcmask 1041409  }
   0x7   :  { %v109_v9 = vld [vmem:[%s715_s2] sm:$0xff]  ;;  %v213_v17 = vld [vmem:[%s717_s4 + $0x38] sm:$0xff]  ;;  %v212_v20 = vld [vmem:[%s717_s4 + $0x30] sm:$0xff]  ;;  %vm370_vm3 = vcmask 261120   ;;  %s470_s27 = smov [#allocation2]   ;;  %vm394_vm4 = vcmask 9216  }
   0x8   :  { %142 = vmatpush.msra.mxu2 %v109_v9  ;;  %v439_v15 = vld [vmem:[%s716_s3] ss:$0 sm:$0xff]  ;;  %430 = vmatpush.msrb.mxu1 %v213_v17  ;;  %v211_v22 = vld [vmem:[%s717_s4 + $0x28] sm:$0xff]  ;;  %v209_v31 = vld [vmem:[%s717_s4 + $0x18] sm:$0xff]  ;;  %s401_s3 = sshll.u32 %s470_s27, 4  ;;  %s402_s3 = int_to_ptr.vmem [resolvable:$true] %s401_s3 }
   0x9   :  { %v210_v24 = vld [vmem:[%s717_s4 + $0x20] sm:$0xff]  ;;  %v208_v32 = vld [vmem:[%s717_s4 + $0x10] sm:$0xff]  ;;  %v207_v33 = vld [vmem:[%s717_s4 + $0x8] sm:$0xff] }
   0xa   :  { %431 = vmatpush.msrb.mxu1 %v212_v20  ;;  %v206_v34 = vld [vmem:[%s717_s4] sm:$0xff]  ;;  %v289_v39 = vld [vmem:[%s719_s6 + $0x38] sm:$0xff]  ;;  %v288_v40 = vld [vmem:[%s719_s6 + $0x30] sm:$0xff] }
   0xb   :  { %v287_v41 = vld [vmem:[%s719_s6 + $0x28] sm:$0xff]  ;;  %v286_v42 = vld [vmem:[%s719_s6 + $0x20] sm:$0xff]  ;;  %v285_v44 = vld [vmem:[%s719_s6 + $0x18] sm:$0xff] }
   0xc   :  { %432 = vmatpush.msrb.mxu1 %v211_v22  ;;  %v440_v43 = vld [vmem:[%s718_s5] ss:$0 sm:$0xff]  ;;  %v284_v46 = vld [vmem:[%s719_s6 + $0x10] sm:$0xff]  ;;  %v283_v47 = vld [vmem:[%s719_s6 + $0x8] sm:$0xff] }
   0xd   :  { %413 = vmatmul.msk.f32.gmra.mxu0 %vm50_vm0, %v43_v7  ;;  %v282_v51 = vld [vmem:[%s719_s6] sm:$0xff]  ;;  %v336_v54 = vld [vmem:[%s721_s8 + $0x78] sm:$0xff]  ;;  %v335_v55 = vld [vmem:[%s721_s8 + $0x70] sm:$0xff] }
   0xe   :  { %415 = vmatmul.msk.f32.gmra.mxu1 %vm50_vm0, %v45_v8  ;;  %341 = vmatpush.msrb.mxu2 %v336_v54  ;;  %v334_v57 = vld [vmem:[%s721_s8 + $0x68] sm:$0xff]  ;;  %v333_v60 = vld [vmem:[%s721_s8 + $0x60] sm:$0xff]  ;;  %v332_v62 = vld [vmem:[%s721_s8 + $0x58] sm:$0xff] }
   0xf   :  { %433 = vmatpush.msrb.mxu1 %v210_v24  ;;  %v331_v0 = vld [vmem:[%s721_s8 + $0x50] sm:$0xff]  ;;  %v329_v6 = vld [vmem:[%s721_s8 + $0x40] sm:$0xff]  ;;  %v328_v9 = vld [vmem:[%s721_s8 + $0x38] sm:$0xff] }
  0x10   :  { %342 = vmatpush.msrb.mxu2 %v335_v55 }
  0x11   :  { %434 = vmatpush.msrb.mxu1 %v209_v31 }
  0x12   :  { %343 = vmatpush.msrb.mxu2 %v334_v57 }
  0x13   :  { %435 = vmatpush.msrb.mxu1 %v208_v32 }
  0x14   :  { %344 = vmatpush.msrb.mxu2 %v333_v60 }
  0x15   :  { %436 = vmatpush.msrb.mxu1 %v207_v33 }
  0x16   :  { %345 = vmatpush.msrb.mxu2 %v332_v62 }
  0x17   :  { %437 = vmatpush.msrb.mxu1 %v206_v34 }
  0x18   :  { %346 = vmatpush.msrb.mxu2 %v331_v0 }
  0x82   :  { %v74_v10 = vpop.f32.mrf.mxu0 }
  0x83   :  { %416 = vmatmul.msk.f32.vlgmr.msra.gmra.mxu2 %vm50_vm0, %v74_v10  ;;  %v103_v12 = vpop.f32.mrf.mxu1 }
  0x8a   :  { %v77_v11 = vpop.f32.mrf.mxu0 }
  0x8b   :  { %417 = vmatmul.msk.f32.gmra.mxu2 %vm50_vm0, %v77_v11  ;;  %v106_v13 = vpop.f32.mrf.mxu1 }
  0x93   :  { %418 = vmatmul.msk.f32.gmra.mxu2 %vm50_vm0, %v103_v12  ;;  %v327_v12 = vld [vmem:[%s721_s8 + $0x30] sm:$0xff] }
  0x9b   :  { %419 = vmatmul.msk.f32.gmra.mxu2 %vm50_vm0, %v106_v13 }
 0x106   :  { %v144_v14 = vpop.f32.mrf.mxu2 }
 0x107   :  { %v145_v18 = vadd.f32 %v439_v15, %v144_v14 }
 0x109   :  { %v156_v23 = vmax.f32 %v145_v18, 0.0 }
 0x10e   :  { %v147_v16 = vpop.f32.mrf.mxu2 }
 0x10f   :  { %v148_v19 = vadd.f32 %v439_v15, %v147_v16 }
 0x111   :  { %v157_v21 = vmax.f32 %v148_v19, 0.0 }
 0x113   :  { %174 = vmatpush.msra.mxu3 %v157_v21 }
 0x115   :  { %175 = vmatpush.msra.mxu3 %v156_v23 }
 0x116   :  { %v150_v25 = vpop.f32.mrf.mxu2  ;;  %420 = vmatmul.msk.f32.vlgmr.msra.gmra.mxu3 %vm50_vm0, %v42_v2  ;;  %v330_v2 = vld [vmem:[%s721_s8 + $0x48] sm:$0xff] }
 0x117   :  { %v151_v27 = vadd.f32 %v439_v15, %v150_v25  ;;  %308 = vmatpush.msrb.mxu3 %v289_v39  ;;  %347 = vmatpush.msrb.mxu2 %v330_v2  ;;  %v442_v39 = vld [vmem:[%s722_s9] ss:$0 sm:$0xff] }
 0x119   :  { %v158_v30 = vmax.f32 %v151_v27, 0.0  ;;  %309 = vmatpush.msrb.mxu3 %v288_v40  ;;  %348 = vmatpush.msrb.mxu2 %v329_v6 }
 0x11b   :  { %310 = vmatpush.msrb.mxu3 %v287_v41  ;;  %349 = vmatpush.msrb.mxu2 %v328_v9 }
 0x11d   :  { %311 = vmatpush.msrb.mxu3 %v286_v42  ;;  %350 = vmatpush.msrb.mxu2 %v327_v12 }
 0x11e   :  { %v153_v26 = vpop.f32.mrf.mxu2  ;;  %421 = vmatmul.msk.f32.gmra.mxu3 %vm50_vm0, %v43_v7 }
 0x11f   :  { %v154_v28 = vadd.f32 %v439_v15, %v153_v26  ;;  %312 = vmatpush.msrb.mxu3 %v285_v44  ;;  %v326_v15 = vld [vmem:[%s721_s8 + $0x28] sm:$0xff] }
 0x120   :  { %351 = vmatpush.msrb.mxu2 %v326_v15 }
 0x121   :  { %v159_v29 = vmax.f32 %v154_v28, 0.0  ;;  %313 = vmatpush.msrb.mxu3 %v284_v46  ;;  %v323_v28 = vld [vmem:[%s721_s8 + $0x10] sm:$0xff] }
 0x123   :  { %197 = vmatpush.msrb.mxu0 %v159_v29  ;;  %314 = vmatpush.msrb.mxu3 %v283_v47  ;;  %v322_v29 = vld [vmem:[%s721_s8 + $0x8] sm:$0xff] }
 0x125   :  { %198 = vmatpush.msrb.mxu0 %v158_v30  ;;  %315 = vmatpush.msrb.mxu3 %v282_v51  ;;  %v321_v30 = vld [vmem:[%s721_s8] sm:$0xff] }
 0x126   :  { %422 = vmatmul.msk.f32.vlgmr.msrb.gmra.mxu0 %vm50_vm0, %v44_v5 }
 0x127   :  { %239 = vmatpush.msra.mxu0 %v213_v17  ;;  %v325_v17 = vld [vmem:[%s721_s8 + $0x20] sm:$0xff] }
 0x128   :  { %352 = vmatpush.msrb.mxu2 %v325_v17 }
 0x129   :  { %240 = vmatpush.msra.mxu0 %v212_v20  ;;  %v324_v20 = vld [vmem:[%s721_s8 + $0x18] sm:$0xff] }
 0x12a   :  { %353 = vmatpush.msrb.mxu2 %v324_v20 }
 0x12b   :  { %241 = vmatpush.msra.mxu0 %v211_v22 }
 0x12c   :  { %354 = vmatpush.msrb.mxu2 %v323_v28 }
 0x12d   :  { %242 = vmatpush.msra.mxu0 %v210_v24 }
 0x12e   :  { %423 = vmatmul.msk.f32.gmra.mxu0 %vm50_vm0, %v45_v8  ;;  %355 = vmatpush.msrb.mxu2 %v322_v29 }
 0x12f   :  { %243 = vmatpush.msra.mxu0 %v209_v31  ;;  %v365_v31 = vld [vmem:[%s723_s10 + $0x18] sm:$0xff] }
 0x130   :  { %356 = vmatpush.msrb.mxu2 %v321_v30  ;;  %386 = vmatpush.msra.mxu3 %v365_v31 }
 0x131   :  { %244 = vmatpush.msra.mxu0 %v208_v32  ;;  %v441_v32 = vld [vmem:[%s720_s7] ss:$0 sm:$0xff] }
 0x133   :  { %245 = vmatpush.msra.mxu0 %v207_v33 }
 0x135   :  { %246 = vmatpush.msra.mxu0 %v206_v34 }
 0x199   :  { %v177_v35 = vpop.f32.mrf.mxu3 }
 0x19a   :  { %424 = vmatmul.msk.f32.vlgmr.msra.gmra.mxu0 %vm218_vm1, %v177_v35 }
 0x1a1   :  { %v180_v36 = vpop.f32.mrf.mxu3 }
 0x1a2   :  { %425 = vmatmul.msk.f32.vlgmr.msrb.gmra.mxu1 %vm218_vm1, %v180_v36  ;;  %v364_v36 = vld [vmem:[%s723_s10 + $0x10] sm:$0xff] }
 0x1a3   :  { %v200_v37 = vpop.f32.mrf.mxu0  ;;  %387 = vmatpush.msra.mxu3 %v364_v36 }
 0x1aa   :  { %426 = vmatmul.msk.f32.gmra.mxu1 %vm218_vm1, %v200_v37  ;;  %v363_v37 = vld [vmem:[%s723_s10 + $0x8] sm:$0xff] }
 0x1ab   :  { %v203_v38 = vpop.f32.mrf.mxu0  ;;  %388 = vmatpush.msra.mxu3 %v363_v37 }
 0x1b2   :  { %427 = vmatmul.msk.f32.gmra.mxu1 %vm218_vm1, %v203_v38  ;;  %v362_v38 = vld [vmem:[%s723_s10] sm:$0xff]  ;;  %s403_s10 = sshll.u32 %s725_s12, 4  ;;  %s404_s10 = int_to_ptr.hbm [resolvable:$true] %s403_s10 }
 0x1b3   :  { %389 = vmatpush.msra.mxu3 %v362_v38 }
 0x217   :  { %v248_v45 = vpop.f32.mrf.mxu0 }
 0x218   :  { %v249_v49 = vadd.f32 %v440_v43, %v248_v45 }
 0x21a   :  { %v260_v53 = vmax.f32 %v249_v49, 0.0 }
 0x21c   :  { %v264_v59 = vsel %vm218_vm1, %v260_v53, 0.0 }
 0x21f   :  { %v251_v48 = vpop.f32.mrf.mxu1 }
 0x220   :  { %v252_v50 = vadd.f32 %v440_v43, %v251_v48 }
 0x222   :  { %v261_v52 = vmax.f32 %v252_v50, 0.0 }
 0x224   :  { %v265_v56 = vsel %vm218_vm1, %v261_v52, 0.0 }
 0x225   :  { %v266_v61 = vadd.f32 %v265_v56, %v264_v59 }
 0x227   :  { %v254_v58 = vpop.f32.mrf.mxu1  ;;  %v267_v1 = vrot.slane %v266_v61, 4 }
 0x228   :  { %v255_v63 = vadd.f32 %v440_v43, %v254_v58 }
 0x229   :  { %v268_v7 = vadd.f32 %v267_v1, %v266_v61 }
 0x22a   :  { %v262_v4 = vmax.f32 %v255_v63, 0.0 }
 0x22b   :  { %v269_v13 = vrot.slane %v268_v7, 2 }
 0x22c   :  { %v273_v10 = vsel %vm218_vm1, %v262_v4, 0.0 }
 0x22d   :  { %v270_v18 = vadd.f32 %v269_v13, %v268_v7 }
 0x22f   :  { %v257_v3 = vpop.f32.mrf.mxu1  ;;  %v271_v23 = vrot.slane %v270_v18, 1 }
 0x230   :  { %v258_v5 = vadd.f32 %v440_v43, %v257_v3  ;;  %v443_v43 = vld [vmem:[%s724_s11] ss:$0 sm:$0xff] }
 0x231   :  { %v272_v25 = vadd.f32 %v271_v23, %v270_v18 }
 0x232   :  { %v263_v8 = vmax.f32 %v258_v5, 0.0 }
 0x234   :  { %v274_v11 = vsel %vm218_vm1, %v263_v8, 0.0 }
 0x235   :  { %v275_v14 = vadd.f32 %v274_v11, %v273_v10 }
 0x237   :  { %v276_v16 = vrot.slane %v275_v14, 4 }
 0x239   :  { %v277_v19 = vadd.f32 %v276_v16, %v275_v14 }
 0x23b   :  { %v278_v21 = vrot.slane %v277_v19, 2 }
 0x23d   :  { %v279_v22 = vadd.f32 %v278_v21, %v277_v19 }
 0x23f   :  { %v280_v24 = vrot.slane %v279_v22, 1 }
 0x241   :  { %v281_v26 = vadd.f32 %v280_v24, %v279_v22 }
 0x243   :  { %v297_v27 = vsel %vm296_vm2, %v281_v26, %v272_v25 }
 0x244   :  { %428 = vmatmul.msk.f32.vlgmr.msrb.gmra.mxu3 %vm218_vm1, %v297_v27 }
 0x2c7   :  { %v317_v33 = vpop.f32.mrf.mxu3 }
 0x2c8   :  { %v318_v34 = vadd.f32 %v441_v32, %v317_v33 }
 0x2ca   :  { %v320_v35 = vmax.f32 %v318_v34, 0.0 }
 0x2cc   :  { %357 = vmatmul.f32.vlgmr.msrb.gmra.mxu2 %v320_v35 }
 0x34f   :  { %v358_v40 = vpop.f32.mrf.mxu2 }
 0x350   :  { %v359_v41 = vadd.f32 %v442_v39, %v358_v40 }
 0x352   :  { %v361_v42 = vmax.f32 %v359_v41, 0.0 }
 0x354   :  { %429 = vmatmul.msk.f32.vlgmr.msra.gmra.mxu3 %vm370_vm3, %v361_v42 }
 0x3d7   :  { %v391_v44 = vpop.f32.mrf.mxu3 }
 0x3d8   :  { %v392_v45 = vadd.f32 %v443_v43, %v391_v44 }
 0x3da   :  { %395 = vst.msk [vmem:[#allocation2] sm:$0x3] %vm394_vm4, %v392_v45 }
 0x3db   :  { %406 = dma.vmem_to_hbm [thread:$0]  %s402_s3, 32, %s404_s10, [#allocation3]  }
 0x3dc   :  { %468 = dma.done.wait [#allocation3], 32  }
 0x3dd   :  { %469 = vsyncadd [#allocation3], 4294967264 }
 0x3de   :  { %411 = vsyncpa [#allocation3], 1 }

</bundles_post_ra>
